<compile_context>
chip_gen: v7x
topology: tpu7x:2x2x1
jax: 0.10.0
libtpu: 0.0.40
codegen_flags: <defaults>
</compile_context>

<pallas_src>
import functools

import jax
import jax.numpy as jnp
from jax.experimental import pallas as pl
from jax.experimental.pallas import tpu as pltpu
import numpy as np


# ----------------------------- Pallas kernel --------------------------------
def _resblock_kernel(x_ref, w1_ref, w2_ref, ws_ref, shift_ref, o_ref, *, K, mm_dtype):
    """One grid step = one tile of batch elements.  Layout is (C, L): L = lanes."""
    t1 = shift_ref[0]            # (Cout, 1) f32  (bn1 shift, conv1 bias folded)
    t2 = shift_ref[1]            # (Cout, 1) f32  (bn2 shift, conv2 bias folded)
    ts = shift_ref[2]            # (Cout, 1) f32  (shortcut bn shift / zeros)
    w1 = w1_ref[...]             # (Cout, K*Cin)  bf16, BN1 scale folded in
    w2 = w2_ref[...]             # (Cout, K*Cout) bf16, BN2 scale folded in
    ws = ws_ref[...]             # (Cout, Cin)    bf16, shortcut scale folded in

    offs = tuple(t - K // 2 for t in range(K))      # 'same' padding tap offsets
    B = x_ref.shape[0]

    def conv(h, w_flat):
        # h: (C, L) f32.  Build the K 'same'-padded shifts of h along L (zero fill,
        # static slices — no iota / mask / roll needed) and fuse all taps into a
        # single (Cout, K*C) x (K*C, L) MXU matmul.
        C, L = h.shape
        taps = []
        for d in offs:
            if d == 0:
                taps.append(h)
            elif d > 0:
                taps.append(jnp.concatenate(
                    [h[:, d:], jnp.zeros((C, d), h.dtype)], axis=1))
            else:
                taps.append(jnp.concatenate(
                    [jnp.zeros((C, -d), h.dtype), h[:, :d]], axis=1))
        hcat = jnp.concatenate(taps, axis=0)                       # (K*C, L)
        return jnp.dot(w_flat, hcat.astype(mm_dtype),
                       preferred_element_type=jnp.float32)         # (Cout, L) f32

    for b in range(B):                                             # static unroll
        x = x_ref[b].astype(jnp.float32)                           # (Cin, L)

        # shortcut: 1x1 conv + BN (scale folded into ws, shift = ts)
        residual = jnp.dot(ws, x.astype(mm_dtype),
                           preferred_element_type=jnp.float32) + ts

        # conv1 -> bn1 -> relu     (dropout = identity in eval mode)
        h1 = jnp.maximum(conv(x, w1) + t1, 0.0)

        # conv2 -> bn2 -> (+ residual) -> relu
        h2 = conv(h1, w2) + t2
        o_ref[b] = jnp.maximum(h2 + residual, 0.0).astype(o_ref.dtype)


# --------------------------- batch-tile heuristic -----------------------------
def _choose_batch_tile(N, Cin, Cout, L, K):
    """Pick how many batch elements each grid step processes."""
    # rough f32 VMEM per batch element inside the kernel body
    bytes_per_batch = 4 * L * (Cin + K * Cin + Cout + K * Cout + 2 * Cout)
    budget = 4 * 1024 * 1024                      # ~4 MiB of live block data
    cap = max(1, min(16, budget // max(bytes_per_batch, 1)))
    if N >= 2:
        # keep at least 2 grid steps so both v7x TensorCores get work
        cap = min(cap, max(1, N // 2))
    bt = 1
    for d in range(1, min(cap, N) + 1):           # largest divisor of N <= cap
        if N % d == 0:
            bt = d
    return bt


# ------------------------------- wrapper --------------------------------------
def resblock_pallas(x_ncl, params):
    """x_ncl: (N, Cin, L) float32, PyTorch NCL layout.  Returns (N, Cout, L)."""
    N, Cin, L = x_ncl.shape
    w1, w2, ws, shifts = params["w1"], params["w2"], params["ws"], params["shifts"]
    K = params["K"]
    Cout = w1.shape[0]
    assert w1.shape == (Cout, K * Cin)

    x_ncl = x_ncl.astype(jnp.float32)
    bt = _choose_batch_tile(N, Cin, Cout, L, K)
    grid = (N // bt,)

    flops = 2 * N * L * (K * Cin * Cout + K * Cout * Cout + Cin * Cout)
    bytes_accessed = (x_ncl.size * 4 + N * Cout * L * 4
                      + (w1.size + w2.size + ws.size) * w1.dtype.itemsize
                      + shifts.size * 4)

    def full(arr):
        nd = arr.ndim
        return pl.BlockSpec(arr.shape, lambda n, _nd=nd: (0,) * _nd)

    kernel = functools.partial(_resblock_kernel, K=K, mm_dtype=w1.dtype)

    out = pl.pallas_call(
        kernel,
        out_shape=jax.ShapeDtypeStruct((N, Cout, L), jnp.float32),
        grid_spec=pltpu.PrefetchScalarGridSpec(
            num_scalar_prefetch=0,
            grid=grid,
            in_specs=[
                pl.BlockSpec((bt, Cin, L), lambda n: (n, 0, 0)),   # x  (NCL)
                full(w1),                                          # (Cout, K*Cin)
                full(w2),                                          # (Cout, K*Cout)
                full(ws),                                          # (Cout, Cin)
                full(shifts),                                      # (3, Cout, 1)
            ],
            out_specs=pl.BlockSpec((bt, Cout, L), lambda n: (n, 0, 0)),
        ),
        compiler_params=pltpu.CompilerParams(
            dimension_semantics=("parallel",),
            vmem_limit_bytes=32 * 1024 * 1024,     # explicit; safe on v5e/v6e/v7x
        ),
        cost_estimate=pl.CostEstimate(flops=int(flops), transcendentals=0,
                                      bytes_accessed=int(bytes_accessed)),
    )(x_ncl, w1, w2, ws, shifts)
    return out


# ----------------------- parameter construction ------------------------------
def make_params(key, in_channels, out_channels, kernel_size=3, eps=1e-5,
                matmul_dtype=jnp.bfloat16):
    """Build random ResBlock params and fold BN scales / conv biases for the kernel."""
    f32 = jnp.float32
    K = kernel_size
    ks = jax.random.split(key, 18)

    def bn_scale_shift(i, bias):
        gamma = 1.0 + 0.1 * jax.random.normal(ks[i], (out_channels,), f32)
        beta = 0.1 * jax.random.normal(ks[i + 1], (out_channels,), f32)
        mean = 0.1 * jax.random.normal(ks[i + 2], (out_channels,), f32)
        var = jax.random.uniform(ks[i + 3], (out_channels,), f32, 0.5, 1.5)
        scale = gamma / jnp.sqrt(var + eps)
        shift = beta - mean * scale + bias * scale          # fold conv bias in
        return scale, shift

    # conv1 (PyTorch layout (Cout, Cin, K)) + bias, BN1
    w1_t = 0.1 * jax.random.normal(ks[0], (out_channels, in_channels, K), f32)
    b1 = 0.1 * jax.random.normal(ks[1], (out_channels,), f32)
    s1, t1 = bn_scale_shift(2, b1)

    # conv2 + BN2
    w2_t = 0.1 * jax.random.normal(ks[6], (out_channels, out_channels, K), f32)
    b2 = 0.1 * jax.random.normal(ks[7], (out_channels,), f32)
    s2, t2 = bn_scale_shift(8, b2)

    # shortcut (1x1 conv + BN) only when channel counts differ
    if in_channels != out_channels:
        ws_t = 0.1 * jax.random.normal(ks[12], (out_channels, in_channels, 1), f32)
        bs = 0.1 * jax.random.normal(ks[13], (out_channels,), f32)
        ss, ts = bn_scale_shift(14, bs)
        ws = ws_t[:, :, 0]                                   # (Cout, Cin)
    else:
        ws = jnp.eye(out_channels, dtype=f32)
        ss = jnp.ones((out_channels,), f32)
        ts = jnp.zeros((out_channels,), f32)

    # Fold BN scales into the weights and flatten the K taps so each conv becomes a
    # single (Cout, K*C) x (K*C, L) matmul.  Tap-major / channel-minor layout matches
    # the kernel's concatenation order.
    w1_fold = (jnp.transpose(w1_t, (0, 2, 1)).reshape(out_channels, K * in_channels)
               * s1[:, None])
    w2_fold = (jnp.transpose(w2_t, (0, 2, 1)).reshape(out_channels, K * out_channels)
               * s2[:, None])
    ws_fold = ws * ss[:, None]

    shifts = jnp.stack([t1, t2, ts], axis=0)[:, :, None]     # (3, Cout, 1) f32

    return {
        "K": K,
        "w1": w1_fold.astype(matmul_dtype),
        "w2": w2_fold.astype(matmul_dtype),
        "ws": ws_fold.astype(matmul_dtype),
        "shifts": shifts.astype(f32),
    }


# ------------------------- pure-JAX reference --------------------------------
def resblock_ref(x_ncl, params):
    """Same folded math (bf16 matmul operands, f32 accumulation), pure XLA."""
    x = x_ncl.astype(jnp.float32)
    N, Cin, L = x.shape
    K = params["K"]
    mm = params["w1"].dtype
    t1, t2, ts = params["shifts"]                            # each (Cout, 1)

    def conv(h, w_fold):
        p = K // 2
        hp = jnp.pad(h, ((0, 0), (0, 0), (p, p)))
        taps = jnp.concatenate([hp[:, :, t:t + L] for t in range(K)], axis=1)
        return jnp.einsum("ok,nkl->nol", w_fold, taps.astype(mm),
                          preferred_element_type=jnp.float32)

    residual = jnp.einsum("oc,ncl->nol", params["ws"], x.astype(mm),
                          preferred_element_type=jnp.float32) + ts
    h1 = jnp.maximum(conv(x, params["w1"]) + t1, 0.0)
    h2 = conv(h1, params["w2"]) + t2
    return jnp.maximum(h2 + residual, 0.0)


# --------------------------------- main ---------------------------------------
if __name__ == "__main__":
    key = jax.random.PRNGKey(0)
    kx, kp = jax.random.split(key)

    N, Cin, Cout, L = 2, 4, 8, 16
    x = jax.random.normal(kx, (N, Cin, L), jnp.float32)      # PyTorch NCL input
    params = make_params(kp, Cin, Cout, kernel_size=3)

    out = jax.block_until_ready(resblock_pallas(x, params))
    ref = jax.block_until_ready(resblock_ref(x, params))

    # bf16 matmul operands (f32 accumulation) in both kernel and reference.
    np.testing.assert_allclose(np.asarray(out), np.asarray(ref), rtol=1e-2, atol=1e-2)

    print("KERNEL_OK")
</pallas_src>

<mosaic_0001>
module attributes {stable_mosaic.version = 11 : i64} {
  func.func @_resblock_kernel(%arg0: i32, %arg1: memref<1x4x16xf32, #tpu.memory_space<vmem>>, %arg2: memref<8x12xbf16, #tpu.memory_space<vmem>>, %arg3: memref<8x24xbf16, #tpu.memory_space<vmem>>, %arg4: memref<8x4xbf16, #tpu.memory_space<vmem>>, %arg5: memref<3x8x1xf32, #tpu.memory_space<vmem>>, %arg6: memref<1x8x16xf32, #tpu.memory_space<vmem>>) attributes {dimension_semantics = [#tpu.dimension_semantics<parallel>], iteration_bounds = array<i64: 2>, scalar_prefetch = 0 : i64, scratch_operands = 0 : i64, tpu.core_type = #tpu.core_type<tc>, window_params = [{transform_indices = @transform_0, window_bounds = array<i64: 1, 4, 16>}, {pipeline_mode = #tpu.pipeline_mode<synchronous>, transform_indices = @transform_1, window_bounds = array<i64: 8, 12>}, {pipeline_mode = #tpu.pipeline_mode<synchronous>, transform_indices = @transform_2, window_bounds = array<i64: 8, 24>}, {pipeline_mode = #tpu.pipeline_mode<synchronous>, transform_indices = @transform_3, window_bounds = array<i64: 8, 4>}, {pipeline_mode = #tpu.pipeline_mode<synchronous>, transform_indices = @transform_4, window_bounds = array<i64: 3, 8, 1>}, {transform_indices = @transform_5, window_bounds = array<i64: 1, 8, 16>}]} {
    %c0 = arith.constant 0 : index
    %c0_0 = arith.constant 0 : index
    %c0_1 = arith.constant 0 : index
    %0 = vector.load %arg5[%c0, %c0_0, %c0_1] : memref<3x8x1xf32, #tpu.memory_space<vmem>>, vector<1x8x1xf32>
    %1 = vector.shape_cast %0 : vector<1x8x1xf32> to vector<8x1xf32>
    %c1 = arith.constant 1 : index
    %c0_2 = arith.constant 0 : index
    %c0_3 = arith.constant 0 : index
    %2 = vector.load %arg5[%c1, %c0_2, %c0_3] : memref<3x8x1xf32, #tpu.memory_space<vmem>>, vector<1x8x1xf32>
    %3 = vector.shape_cast %2 : vector<1x8x1xf32> to vector<8x1xf32>
    %c2 = arith.constant 2 : index
    %c0_4 = arith.constant 0 : index
    %c0_5 = arith.constant 0 : index
    %4 = vector.load %arg5[%c2, %c0_4, %c0_5] : memref<3x8x1xf32, #tpu.memory_space<vmem>>, vector<1x8x1xf32>
    %5 = vector.shape_cast %4 : vector<1x8x1xf32> to vector<8x1xf32>
    %c0_6 = arith.constant 0 : index
    %c0_7 = arith.constant 0 : index
    %6 = vector.load %arg2[%c0_6, %c0_7] : memref<8x12xbf16, #tpu.memory_space<vmem>>, vector<8x12xbf16>
    %c0_8 = arith.constant 0 : index
    %c0_9 = arith.constant 0 : index
    %7 = vector.load %arg3[%c0_8, %c0_9] : memref<8x24xbf16, #tpu.memory_space<vmem>>, vector<8x24xbf16>
    %c0_10 = arith.constant 0 : index
    %c0_11 = arith.constant 0 : index
    %8 = vector.load %arg4[%c0_10, %c0_11] : memref<8x4xbf16, #tpu.memory_space<vmem>>, vector<8x4xbf16>
    %c0_12 = arith.constant 0 : index
    %c0_13 = arith.constant 0 : index
    %c0_14 = arith.constant 0 : index
    %9 = vector.load %arg1[%c0_12, %c0_13, %c0_14] : memref<1x4x16xf32, #tpu.memory_space<vmem>>, vector<1x4x16xf32>
    %10 = vector.shape_cast %9 : vector<1x4x16xf32> to vector<4x16xf32>
    %11 = arith.truncf %10 : vector<4x16xf32> to vector<4x16xbf16>
    %cst = arith.constant dense<0.000000e+00> : vector<8x16xf32>
    %12 = tpu.matmul %8, %11, %cst {dimension_numbers = #tpu.dot_dimension_numbers<[1], [0], [0], [1], [0, 0, 1, 1], [], []>} : vector<8x4xbf16>, vector<4x16xbf16>, vector<8x16xf32> -> vector<8x16xf32>
    %13 = vector.broadcast %5 : vector<8x1xf32> to vector<8x16xf32>
    %14 = arith.addf %12, %13 : vector<8x16xf32>
    %cst_15 = arith.constant 0.000000e+00 : f32
    %15 = vector.broadcast %cst_15 : f32 to vector<4x1xf32>
    %16 = vector.extract_strided_slice %10 {offsets = [0, 0], sizes = [4, 15], strides = [1, 1]} : vector<4x16xf32> to vector<4x15xf32>
    %17 = tpu.concatenate %15, %16 in 1 : vector<4x1xf32>, vector<4x15xf32> -> vector<4x16xf32>
    %18 = vector.extract_strided_slice %10 {offsets = [0, 1], sizes = [4, 15], strides = [1, 1]} : vector<4x16xf32> to vector<4x15xf32>
    %cst_16 = arith.constant 0.000000e+00 : f32
    %19 = vector.broadcast %cst_16 : f32 to vector<4x1xf32>
    %20 = tpu.concatenate %18, %19 in 1 : vector<4x15xf32>, vector<4x1xf32> -> vector<4x16xf32>
    %21 = tpu.concatenate %17, %10, %20 in 0 : vector<4x16xf32>, vector<4x16xf32>, vector<4x16xf32> -> vector<12x16xf32>
    %22 = arith.truncf %21 : vector<12x16xf32> to vector<12x16xbf16>
    %cst_17 = arith.constant dense<0.000000e+00> : vector<8x16xf32>
    %23 = tpu.matmul %6, %22, %cst_17 {dimension_numbers = #tpu.dot_dimension_numbers<[1], [0], [0], [1], [0, 0, 1, 1], [], []>} : vector<8x12xbf16>, vector<12x16xbf16>, vector<8x16xf32> -> vector<8x16xf32>
    %24 = vector.broadcast %1 : vector<8x1xf32> to vector<8x16xf32>
    %25 = arith.addf %23, %24 : vector<8x16xf32>
    %cst_18 = arith.constant 0.000000e+00 : f32
    %26 = vector.broadcast %cst_18 : f32 to vector<8x16xf32>
    %27 = arith.maximumf %25, %26 : vector<8x16xf32>
    %cst_19 = arith.constant 0.000000e+00 : f32
    %28 = vector.broadcast %cst_19 : f32 to vector<8x1xf32>
    %29 = vector.extract_strided_slice %27 {offsets = [0, 0], sizes = [8, 15], strides = [1, 1]} : vector<8x16xf32> to vector<8x15xf32>
    %30 = tpu.concatenate %28, %29 in 1 : vector<8x1xf32>, vector<8x15xf32> -> vector<8x16xf32>
    %31 = vector.extract_strided_slice %27 {offsets = [0, 1], sizes = [8, 15], strides = [1, 1]} : vector<8x16xf32> to vector<8x15xf32>
    %cst_20 = arith.constant 0.000000e+00 : f32
    %32 = vector.broadcast %cst_20 : f32 to vector<8x1xf32>
    %33 = tpu.concatenate %31, %32 in 1 : vector<8x15xf32>, vector<8x1xf32> -> vector<8x16xf32>
    %34 = tpu.concatenate %30, %27, %33 in 0 : vector<8x16xf32>, vector<8x16xf32>, vector<8x16xf32> -> vector<24x16xf32>
    %35 = arith.truncf %34 : vector<24x16xf32> to vector<24x16xbf16>
    %cst_21 = arith.constant dense<0.000000e+00> : vector<8x16xf32>
    %36 = tpu.matmul %7, %35, %cst_21 {dimension_numbers = #tpu.dot_dimension_numbers<[1], [0], [0], [1], [0, 0, 1, 1], [], []>} : vector<8x24xbf16>, vector<24x16xbf16>, vector<8x16xf32> -> vector<8x16xf32>
    %37 = vector.broadcast %3 : vector<8x1xf32> to vector<8x16xf32>
    %38 = arith.addf %36, %37 : vector<8x16xf32>
    %39 = arith.addf %38, %14 : vector<8x16xf32>
    %cst_22 = arith.constant 0.000000e+00 : f32
    %40 = vector.broadcast %cst_22 : f32 to vector<8x16xf32>
    %41 = arith.maximumf %39, %40 : vector<8x16xf32>
    %c0_23 = arith.constant 0 : index
    %c0_24 = arith.constant 0 : index
    %c0_25 = arith.constant 0 : index
    %42 = vector.load %arg6[%c0_23, %c0_24, %c0_25] : memref<1x8x16xf32, #tpu.memory_space<vmem>>, vector<1x8x16xf32>
    %43 = vector.shape_cast %42 : vector<1x8x16xf32> to vector<8x16xf32>
    %44 = vector.shape_cast %41 : vector<8x16xf32> to vector<1x8x16xf32>
    tpu.vector_store %arg6[%c0_23, %c0_24, %c0_25], %44 {strides = array<i32>} : memref<1x8x16xf32, #tpu.memory_space<vmem>>, vector<1x8x16xf32>,
    return
  }
  func.func @transform_0(%arg0: i32) -> (i32, i32, i32) {
    %c0_i32 = arith.constant 0 : i32
    %c0_i32_0 = arith.constant 0 : i32
    %c0_i32_1 = arith.constant 0 : i32
    return %arg0, %c0_i32, %c0_i32_0 : i32, i32, i32
  }
  func.func @transform_1(%arg0: i32) -> (i32, i32) {
    %c0_i32 = arith.constant 0 : i32
    %c0_i32_0 = arith.constant 0 : i32
    %c0_i32_1 = arith.constant 0 : i32
    return %c0_i32, %c0_i32_0 : i32, i32
  }
  func.func @transform_2(%arg0: i32) -> (i32, i32) {
    %c0_i32 = arith.constant 0 : i32
    %c0_i32_0 = arith.constant 0 : i32
    %c0_i32_1 = arith.constant 0 : i32
    return %c0_i32, %c0_i32_0 : i32, i32
  }
  func.func @transform_3(%arg0: i32) -> (i32, i32) {
    %c0_i32 = arith.constant 0 : i32
    %c0_i32_0 = arith.constant 0 : i32
    %c0_i32_1 = arith.constant 0 : i32
    return %c0_i32, %c0_i32_0 : i32, i32
  }
  func.func @transform_4(%arg0: i32) -> (i32, i32, i32) {
    %c0_i32 = arith.constant 0 : i32
    %c0_i32_0 = arith.constant 0 : i32
    %c0_i32_1 = arith.constant 0 : i32
    %c0_i32_2 = arith.constant 0 : i32
    return %c0_i32, %c0_i32_0, %c0_i32_1 : i32, i32, i32
  }
  func.func @transform_5(%arg0: i32) -> (i32, i32, i32) {
    %c0_i32 = arith.constant 0 : i32
    %c0_i32_0 = arith.constant 0 : i32
    %c0_i32_1 = arith.constant 0 : i32
    return %arg0, %c0_i32, %c0_i32_0 : i32, i32, i32
  }
}

</mosaic_0001>

<bundles_post_ra>
// kernel: tpu_custom_call.1
= control target key start
LH: loop header
LB: loop body
LE: loop exit
PB: predicated region body
PF: predicated region fallthrough
CT: control target
= control target key end

     0   :  { %10 = vsyncpa [#allocation3], 0  ;;  %s832_s0 = inlined_call_operand.vmem [shape: f32[2,4,16], index: 0, kind: input, shape index: {}]   ;;  %s833_s1 = inlined_call_operand.vmem [shape: bf16[8,12], index: 1, kind: input, shape index: {}]   ;;  %s834_s2 = inlined_call_operand.vmem [shape: bf16[8,24], index: 2, kind: input, shape index: {}]   ;;  %s835_s3 = inlined_call_operand.vmem [shape: bf16[8,4], index: 3, kind: input, shape index: {}]   ;;  %s836_s4 = inlined_call_operand.vmem [shape: f32[3,8,1], index: 4, kind: input, shape index: {}]   ;;  %s837_s5 = inlined_call_operand.hbm [shape: f32[2,8,16], index: 5, kind: output, shape index: {}]  }
   0x1   :  { %12 = vsyncpa [#allocation3 + $0x1], 0  ;;  %s694_s18 = smov 0   ;;  %s696_s19 = smov 0  }
   0x2   :  { %s698_s20 = smov 0   ;;  %s700_s21 = smov 0  }
   0x3 LB: > { %s715_s22 = sadd.s32 4294967295, %s655_s21   ;;  %s494_s23 = sadd.s32 4294967294, %s655_s21   ;;  %s655_s21 = sphi %s700_s21, %s843_s21   ;;  %s651_s20 = sphi %s698_s20, %s842_s20   ;;  %s647_s19 = sphi %s696_s19, %s841_s19   ;;  %s643_s18 = sphi %s694_s18, %s840_s18  }
   0x4   : > { %s719_s24 = sadd.s32 1, %s655_s21   ;;  %s135_s25 = sadd.s32 1, %s651_s20 }
   0x5   : > { %s132_s26 = ssub.s32 %s655_s21, %s719_s24  ;;  %p145_p0 = scmp.ne.s32.totalorder %s651_s20, %s647_s19 }
   0x6   : > { %p133_p1 = scmp.eq.s32.totalorder %s132_s26, 0  ;;  %p146_p2 = scmp.eq.s32.totalorder %s715_s22, 1 }
   0x7   : > { %p151_p3 = scmp.ne.s32.totalorder %s647_s19, %s643_s18  ;;  %p152_p4 = scmp.eq.s32.totalorder %s494_s23, 1 }
   0x8   : > { %s730_s27 = scalar_select %p133_p1, %s651_s20, %s135_s25  }
   0x9   : > { %p732_p5 = por %p146_p2, %p145_p0  ;;  %p736_p6 = por %p152_p4, %p151_p3 }
   0xa   : > { %p497_p7 = scmp.ge.s32.totalorder %s655_s21, 1  ;;  %p189_p8 = scmp.lt.s32.totalorder %s655_s21, 3 }
   0xc   : > { %p190_p9 = pnand %p497_p7, %p189_p8 }
   0xd   : > { %p216_p10 = scmp.lt.s32.totalorder (!%p190_p9), %s715_s22, 1  ;;  %v657_v0 = vmov (!%p190_p9), 0.0   ;;  %vm658_vm0 = vmmov (!%p190_p9), 0   ;;  %v221_v1 = vld [vmem:[%s836_s4] sm:$0xff] (!%p190_p9)  ;;  %v659_v3 = vmov (!%p190_p9), 0   ;;  %s660_s12 = smov (!%p190_p9), 1  }
   0xe   : > { %193 = sbr.rel (%p190_p9) target bundleno = 722 (0x2d2), region = 40  ;;  %526 = vmatprep.subr.bf16.mxu1 (!%p190_p9), %v657_v0  ;;  %520 = vmatprep.subr.bf16.mxu0 (!%p190_p9), %v657_v0  ;;  %s661_s13 = smov (!%p190_p9), 127   ;;  %vm288_vm1 = vcmask (!%p190_p9), 7168   ;;  %vm293_vm2 = vcmask (!%p190_p9), 121856   ;;  %vm297_vm3 = vcmask (!%p190_p9), 1043456   ;;  %vm309_vm4 = vcmask (!%p190_p9), 1045504  }
   0xf   : > { %528 = vmatprep.mubr.msk.bf16.mxu1 (!%p190_p9), %vm658_vm0, %v657_v0  ;;  %522 = vmatprep.mubr.msk.bf16.mxu0 (!%p190_p9), %vm658_vm0, %v657_v0  ;;  %v226_v12 = vld [vmem:[%s833_s1] sm:$0xf] (!%p190_p9)  ;;  %vm305_vm5 = vcmask (!%p190_p9), 97280   ;;  %vm240_vm6 = vcmask (!%p190_p9), 1041408   ;;  %vm236_vm7 = vcmask (!%p190_p9), 31744   ;;  %v500_v23 = vld [vmem:[%s836_s4 + $0x8] sm:$0xff] (!%p190_p9)  ;;  %vm504_vm8 = vmneg (!%p190_p9), %vm288_vm1 }
  0x10   : > { %591 = vset.pattern.permute.xlu1 (!%p190_p9), %v659_v3  ;;  %592 = vset.pattern.permute.xlu0 (!%p190_p9), %v659_v3  ;;  %v228_v15 = vld [vmem:[%s835_s3] sm:$0xf] (!%p190_p9)  ;;  %v501_v24 = vld [vmem:[%s836_s4 + $0x10] sm:$0xff] (!%p190_p9)  ;;  %vm662_vm9 = vmmov (!%p190_p9), 1   ;;  %vm370_vm11 = vcmask (!%p190_p9), 195584   ;;  %s213_s8 = sand.u32 (!%p190_p9), 1, %s647_s19  }
  0x11   : > { %302 = vperm.xlu1 (!%p190_p9), %591, %v221_v1   ;;  %vm505_vm10 = vmpackc.low (!%p190_p9), %vm662_vm9, %vm504_vm8  ;;  %v227_v31 = vld [vmem:[%s834_s2] sm:$0xf] (!%p190_p9)  ;;  %s510_s10 = sshll.u32 (!%p190_p9), %s715_s22, 7  ;;  %vm419_vm12 = vcmask (!%p190_p9), 130048   ;;  %s663_s17 = smov (!%p190_p9), [#allocation2]  }
  0x12   : > { %s790_s15 = scalar_lea.hbm (!%p190_p9), %s837_s5, %s510_s10  ;;  %s597_s23 = sshll.u32 (!%p190_p9), %s663_s17, 4  ;;  %s598_s23 = int_to_ptr.vmem [resolvable:$false] %s597_s23 }
  0x13   : > { %s599_s25 = scalar_lea.vmem (!%p190_p9), %s598_s23, 256 }
  0x15   : > { %s217_s30 = scalar_select %p216_p10, %s715_s22, 1 }
  0x16   : > { %s422_s22 = scalar_lea.sflag [#allocation3], %s213_s8 }
  0x17   : > { %s499_s6 = sshll.u32 %s217_s30, 2 }
  0x18   : > { %s219_s9 = scalar_lea.vmem %s832_s0, %s499_s6 }
  0x19   : > { %v229_v2 = vld [vmem:[%s219_s9] sm:$0xf]  ;;  %s498_s9 = sshll.u32 %s213_s8, 3 }
  0x1a   : > { %285 = vrot.lane.b32.xlu0 %v229_v2, %s660_s12  ;;  %v295_v5 = vrot.slane %v229_v2, 4  ;;  %v230_v13 = vpack.c.bf16 %v229_v2, %v229_v2  ;;  %s215_s11 = scalar_lea.vmem [#allocation2], %s498_s9 }
  0x1c   : > { %v242_v14 = vsel %vm240_vm6, %v230_v13, 0 }
  0x1d   : > { %521 = vmatpush3.bf16.msra.mxu0 %v242_v14 }
  0x1e   : > { %290 = vrot.lane.b32.xlu0 %v229_v2, %s661_s13  ;;  %532 = vmatprep.subr.bf16.mxu0 %v657_v0 }
  0x20   : > { %523 = vmatmul.mubr.msk.bf16.vlgmr.msra.gmra.mrb[0].mxu0 %vm236_vm7, %v228_v15 }
  0x21   : > { %536 = vmatprep.mubr.msk.bf16.mxu0 %vm658_vm0, %v657_v0 }
  0x8c   : > { %v286_v4 = vpop.permute.xlu0 %285 }
  0x8d   : > { %v289_v6 = vsel %vm288_vm1, 0.0, %v286_v4 }
  0x8e   : > { %v298_v9 = vsel %vm297_vm3, %v289_v6, %v295_v5 }
  0x90   : > { %v291_v7 = vpop.permute.xlu0 %290  ;;  %v303_v16 = vpop.permute.xlu1 %302 }
  0x91   : > { %v294_v8 = vsel %vm293_vm2, %v291_v7, 0.0 }
  0x92   : > { %v299_v10 = vpack.c.bf16 %v294_v8, %v298_v9 }
  0x94   : > { %v311_v11 = vsel %vm309_vm4, %v299_v10, 0 }
  0x95   : > { %527 = vmatpush3.bf16.msra.mxu1 %v311_v11 }
  0x98   : > { %529 = vmatmul.mubr.msk.bf16.vlgmr.msra.gmra.mrb[0].mxu1 %vm305_vm5, %v226_v12 }
 0x16b   : > { %v347_v17 = vpop.f32.mrb[0].mxu1 }
 0x16c   : > { %v348_v18 = vadd.f32 %v347_v17, %v303_v16  ;;  %v530_v19 = vpop.f32.mrb[1].mxu1 }
 0x16d   : > { %v350_v20 = vpop.f32.mrb[2].mxu1 }
 0x16e   : > { %v353_v21 = vmax.f32 %v348_v18, 0.0  ;;  %v531_v22 = vpop.f32.mrb[3].mxu1 }
 0x170   : > { %359 = vrot.lane.b32.xlu0 %v353_v21, %s661_s13  ;;  %355 = vrot.lane.b32.xlu1 %v353_v21, %s660_s12  ;;  %s435_s12 = sshll.u32 %s215_s11, 4  ;;  %s792_s12 = int_to_ptr.vmem [resolvable:$true] %s435_s12 }
 0x171   : > { %s593_s16 = scalar_lea.vmem %s792_s12, 128  ;;  %p600_p0 = scmp.lt.s32.totalorder %s792_s12, %s598_s23 }
 0x172   : > { %p594_p11 = scmp.ne.s32.totalorder %s792_s12, %s593_s16  ;;  %p601_p1 = scmp.lt.s32.totalorder %s599_s25, %s593_s16 }
 0x174   : > { %367 = vperm.xlu0 %592, %v500_v23   ;;  %233 = vperm.xlu1 %591, %v501_v24   ;;  %p595_p12 = pnand %p594_p11, %p732_p5  ;;  %p602_p2 = por %p601_p1, %p600_p0 }
 0x176   : > { %p596_p13 = pneg %p595_p12 }
 0x178   : > { %p603_p3 = pnand %p602_p2, %p596_p13 }
 0x1e2   : > { %v360_v25 = vpop.permute.xlu0 %359  ;;  %v356_v26 = vpop.permute.xlu1 %355 }
 0x1e3   : > { %v362_v27 = vsel %vm293_vm2, %v360_v25, 0.0  ;;  %v506_v28 = vpack.c.bf16 %v353_v21, %v356_v26 }
 0x1e4   : > { %v364_v29 = vpack.c.bf16 %v362_v27, %v362_v27 }
 0x1e5   : > { %533 = vmatpush3.bf16.msk.msra.mxu0 %vm505_vm10, %v506_v28 }
 0x1e6   : > { %534 = vmatprep.subr.bf16.mxu0 %v657_v0  ;;  %v375_v30 = vsel %vm297_vm3, %v364_v29, 0 }
 0x1e9   : > { %535 = vmatpush3.bf16.msra.mxu0 %v375_v30 }
 0x1ec   : > { %537 = vmatmul.mubr.msk.bf16.vlgmr.msra.gmra.mrb[0].mxu0 %vm370_vm11, %v227_v31 }
 0x1f3   : > { %v368_v32 = vpop.permute.xlu0 %367  ;;  %v234_v33 = vpop.permute.xlu1 %233 }
 0x1f4   : > { %v540_v34 = vadd.f32 %v368_v32, %v234_v33 }
 0x2bf   : > { %v411_v35 = vpop.f32.mrb[0].mxu0 }
 0x2c0   : > { %v541_v36 = vadd.f32 %v540_v34, %v411_v35  ;;  %v538_v37 = vpop.f32.mrb[1].mxu0 }
 0x2c1   : > { %v414_v38 = vpop.f32.mrb[2].mxu0 }
 0x2c2   : > { %v418_v39 = vmax.f32 %v541_v36, 0.0  ;;  %v539_v40 = vpop.f32.mrb[3].mxu0 }
 0x2c4   : > { %420 = vst.msk [vmem:[%s215_s11] sm:$0xff] %vm419_vm12, %v418_v39 }
 0x2c5   : > { %606 = shalt.err (!%p603_p3)
}
 0x2c6   : > { %s607_s26 = scalar_lea.hbm %s790_s15, 128  ;;  %s611_s7 = scalar_lea.hbm %s837_s5, 256 }
 0x2c7   : > { %p608_p4 = scmp.ne.s32.totalorder %s790_s15, %s607_s26  ;;  %p612_p9 = scmp.lt.u32.totalorder %s790_s15, %s837_s5 }
 0x2c8   : > { %p613_p10 = scmp.lt.u32.totalorder %s611_s7, %s607_s26  ;;  %p615_p12 = scmp.lt.u32.totalorder %s607_s26, %s790_s15 }
 0x2c9   : > { %p609_p7 = pnand %p608_p4, %p732_p5 }
 0x2ca   : > { %p614_p11 = por %p613_p10, %p612_p9 }
 0x2cb   : > { %p610_p8 = pneg %p609_p7 }
 0x2cc   : > { %p616_p13 = por %p615_p12, %p614_p11 }
 0x2ce   : > { %p617_p0 = pnand %p616_p13, %p610_p8 }
 0x2d0   : > { %620 = shalt.err (!%p617_p0)
}
 0x2d1   : > { %546 = dma.vmem_to_hbm [thread:$0]  (%p732_p5), %s792_s12, 128, %s790_s15, %s422_s22  }
 0x2d2 PF: > { %p552_p1 = scmp.ge.s32.totalorder %s655_s21, 2  ;;  %s447_s10 = sand.u32 1, %s643_s18  }
 0x2d3   : > { %s448_s11 = scalar_lea.sflag [#allocation3], %s447_s10 }
 0x2d4   : > { %p549_p2 = pnand %p552_p1, %p736_p6 }
 0x2d6   : > { %638 = dma.done.wait (!%p549_p2), %s448_s11, 128  }
 0x2d7   : > { %640 = vsyncadd (!%p549_p2), %s448_s11, 4294967168  ;;  %p15_p3 = scmp.ge.s32.totalorder %s719_s24, 4   ;;  %s840_s18 = smov %s647_s19 }
 0x2d8   : > { %s841_s19 = smov %s651_s20  ;;  %s842_s20 = smov %s730_s27 }
 0x2d9   : > { %s843_s21 = smov %s719_s24  ;;  %17 = sbr.rel (!%p15_p3) target bundleno = 3 (0x3), region = 77 }
 0x2e0   :  { %453 = vsyncpa [#allocation3], 1 }
 0x2e1   :  { %455 = vsyncpa [#allocation3 + $0x1], 1 }

</bundles_post_ra>
